<compile_context>
chip_gen: v7x
topology: tpu7x:2x2x1
jax: 0.10.0
libtpu: 0.0.40
codegen_flags: <defaults>
</compile_context>

<pallas_src>
import functools

import jax
import jax.numpy as jnp
from jax.experimental import pallas as pl
from jax.experimental.pallas import tpu as pltpu


def se_kernel(x_ref, w1_ref, b1_ref, w2t_ref, b2_ref, o_ref, *, inv_hw, use_mxu):
    # x_ref block: (Nb, C, HWp); weights are full (tiny) arrays.
    x = x_ref[...]                                          # streamed dtype

    # Squeeze: global average pool over the (zero-padded) spatial lane axis.
    # f32 accumulation without materializing an f32 copy of the whole block;
    # divide by the TRUE HW so padding does not bias the mean.
    s = jnp.sum(x, axis=-1, dtype=jnp.float32) * inv_hw     # (Nb, C) f32

    b1 = b1_ref[...].astype(jnp.float32)                    # (1, Ch)
    b2 = b2_ref[...].astype(jnp.float32)                    # (1, C)

    if use_mxu:
        # Production widths (C>=128, Ch>=8): run both FCs on the otherwise-idle MXU.
        w1t = w1_ref[...].astype(jnp.float32)                # (C, Ch)
        w2t = w2t_ref[...].astype(jnp.float32)               # (Ch, C)
        h = jnp.dot(s, w1t, preferred_element_type=jnp.float32) + b1        # (Nb, Ch)
        h = jnp.maximum(h, 0.0)
        wgt = jnp.dot(h, w2t, preferred_element_type=jnp.float32) + b2      # (Nb, C)
    else:
        # Tiny configs (e.g. C=32, Ch=2): keep off degenerate MXU shapes, use
        # VPU/XLU broadcast-multiply + reduce with C on the lane axis.
        w1 = w1_ref[...].astype(jnp.float32)                 # (Ch, C)
        w2t = w2t_ref[...].astype(jnp.float32)               # (Ch, C)
        h = jnp.sum(s[:, None, :] * w1[None, :, :], axis=-1) + b1           # (Nb, Ch)
        h = jnp.maximum(h, 0.0)
        wgt = jnp.sum(h[:, :, None] * w2t[None, :, :], axis=1) + b2         # (Nb, C)

    wgt = jax.nn.sigmoid(wgt)                                # (Nb, C) f32

    # Scale in the streamed dtype (no full-block f32 materialization).
    o_ref[...] = x * wgt.astype(x.dtype)[:, :, None]


def _tpu_generation():
    try:
        kind = jax.devices()[0].device_kind.lower()
    except Exception:
        return 0
    for g in (7, 6, 5, 4):
        if f"v{g}" in kind:
            return g
    return 0


def _pick_batch_tile(N, per_batch_bytes, target_bytes, *, min_steps=1,
                     prefer_even_steps=False, vmem_cap=None):
    """Largest per-step batch count Nb with Nb | N such that the x block is
    ~target_bytes, the (double-buffered in+out) blocks fit vmem_cap, and the
    grid keeps >= min_steps steps (and an even step count if requested)."""
    nb = int(max(1, min(N, target_bytes // max(per_batch_bytes, 1))))
    if vmem_cap is not None:
        while nb > 1 and 4 * nb * per_batch_bytes > vmem_cap:
            nb -= 1
    while nb > 1 and -(-N // nb) < min_steps:
        nb -= 1
    while N % nb != 0:
        nb -= 1
    if prefer_even_steps and N % 2 == 0:
        while nb > 1 and (N // nb) % 2 != 0:
            nb -= 1
            while N % nb != 0:
                nb -= 1
    return nb


def se_block(x_nchw, w1, b1, w2, b2, *, donate_input=False):
    N, C, H, W = x_nchw.shape
    HW = H * W
    Ch = w1.shape[0]
    dtype = x_nchw.dtype
    itemsize = jnp.dtype(dtype).itemsize

    # Lane-dense spatial axis, padded to a multiple of 128 (unmasked vst path).
    HWp = ((HW + 127) // 128) * 128
    x = x_nchw.reshape(N, C, HW)
    padded = HWp != HW
    if padded:
        x = jnp.pad(x, ((0, 0), (0, 0), (0, HWp - HW)))

    # Excitation layout: MXU path wants (C, Ch) for the first FC, VPU path (Ch, C).
    use_mxu = (C >= 128) and (Ch >= 8)
    w1_arg = jnp.transpose(w1) if use_mxu else w1            # (C, Ch) or (Ch, C)
    w2t = jnp.transpose(w2)                                  # (Ch, C)
    b1r = b1.reshape(1, Ch)
    b2r = b2.reshape(1, C)

    gen = _tpu_generation()
    target_bytes = {7: 6 << 20, 6: 6 << 20, 5: 4 << 20}.get(gen, 4 << 20)
    vmem_cap = (48 << 20) if gen >= 7 else (100 << 20)       # v7x: 64 MiB physical
    per_batch = C * HWp * itemsize
    weight_bytes = (w1.size + w2.size + b1.size + b2.size) * 4
    extra = weight_bytes + (1 << 20)                         # weights + temps/headroom

    if 4 * per_batch + extra > vmem_cap:
        # TODO(synk): spatial sub-tiling / two-pass (squeeze kernel, then scale
        # kernel) for planes too large to double-buffer in scoped VMEM.
        raise ValueError(
            f"SE plane C*HW = {per_batch} bytes too large to double-buffer in VMEM")

    nb = _pick_batch_tile(
        N, per_batch, target_bytes,
        min_steps=2 if gen >= 7 else 1,       # only v7x has 2 TCs to shard across
        prefer_even_steps=gen >= 7,
        vmem_cap=vmem_cap - extra)
    grid = (N // nb,)
    block_bytes = nb * per_batch
    vmem_limit = int(min(max(4 * block_bytes + extra, 32 << 20), vmem_cap))

    kernel = functools.partial(se_kernel, inv_hw=1.0 / HW, use_mxu=use_mxu)

    cost = pl.CostEstimate(
        flops=3 * N * C * HWp + 4 * N * C * Ch,
        transcendentals=N * C,
        bytes_accessed=2 * N * C * HWp * itemsize + weight_bytes)

    out = pl.pallas_call(
        kernel,
        out_shape=jax.ShapeDtypeStruct((N, C, HWp), dtype),
        grid_spec=pltpu.PrefetchScalarGridSpec(
            num_scalar_prefetch=0,
            grid=grid,
            in_specs=[
                pl.BlockSpec((nb, C, HWp), lambda n: (n, 0, 0)),   # x: Nb batches/step
                pl.BlockSpec(w1_arg.shape, lambda n: (0, 0)),      # w1 (layout per path)
                pl.BlockSpec((1, Ch), lambda n: (0, 0)),           # b1
                pl.BlockSpec((Ch, C), lambda n: (0, 0)),           # w2.T
                pl.BlockSpec((1, C), lambda n: (0, 0)),            # b2
            ],
            out_specs=pl.BlockSpec((nb, C, HWp), lambda n: (n, 0, 0)),
        ),
        # Only alias when safe: a fresh padded buffer, or explicit opt-in.
        input_output_aliases=({0: 0} if (donate_input or padded) else {}),
        compiler_params=pltpu.CompilerParams(
            dimension_semantics=("parallel",),
            vmem_limit_bytes=vmem_limit),
        cost_estimate=cost,
    )(x, w1_arg, b1r, w2t, b2r)

    if padded:
        out = out[:, :, :HW]
    return out.reshape(N, C, H, W)


def se_block_ref(x, w1, b1, w2, b2):
    # Pure-JAX reference with identical semantics.
    s = jnp.mean(x, axis=(2, 3))                              # (N, C)
    h = jnp.maximum(s @ w1.T + b1[:, 0], 0.0)                 # (N, Ch)
    w = jax.nn.sigmoid(h @ w2.T + b2[:, 0])                   # (N, C)
    return x * w[:, :, None, None]


if __name__ == "__main__":
    key = jax.random.PRNGKey(0)
    kx, k1, kb1, k2, kb2, kx2 = jax.random.split(key, 6)

    # Module config: channels=32, ratio=16 -> hidden=2.
    C, ratio = 32, 16
    Ch = C // ratio
    # Deterministic parameter init (1x1 conv weights squeezed to 2-D).
    w1 = jax.random.normal(k1, (Ch, C), dtype=jnp.float32) * 0.1   # Conv2d(C, Ch, 1)
    b1 = jax.random.normal(kb1, (Ch, 1), dtype=jnp.float32) * 0.1
    w2 = jax.random.normal(k2, (C, Ch), dtype=jnp.float32) * 0.1   # Conv2d(Ch, C, 1)
    b2 = jax.random.normal(kb2, (C, 1), dtype=jnp.float32) * 0.1

    ok = True

    # Case 1: lane-aligned spatial size (HW = 256).
    x = jax.random.normal(kx, (2, C, 16, 16), dtype=jnp.float32)
    ref = jax.block_until_ready(se_block_ref(x, w1, b1, w2, b2))
    out = jax.block_until_ready(se_block(x, w1, b1, w2, b2))
    ok &= out.shape == x.shape
    ok &= bool(jnp.allclose(out, ref, atol=1e-5, rtol=1e-5))

    # Case 2: non-aligned spatial size (HW = 49) exercising the pad path.
    x2 = jax.random.normal(kx2, (2, C, 7, 7), dtype=jnp.float32)
    ref2 = jax.block_until_ready(se_block_ref(x2, w1, b1, w2, b2))
    out2 = jax.block_until_ready(se_block(x2, w1, b1, w2, b2))
    ok &= out2.shape == x2.shape
    ok &= bool(jnp.allclose(out2, ref2, atol=1e-5, rtol=1e-5))

    assert ok, "mismatch vs reference"
    print("KERNEL_OK")
</pallas_src>

<mosaic_0001>
module attributes {stable_mosaic.version = 11 : i64} {
  func.func @se_kernel(%arg0: i32, %arg1: memref<2x32x256xf32, #tpu.memory_space<vmem>>, %arg2: memref<2x32xf32, #tpu.memory_space<vmem>>, %arg3: memref<1x2xf32, #tpu.memory_space<vmem>>, %arg4: memref<2x32xf32, #tpu.memory_space<vmem>>, %arg5: memref<1x32xf32, #tpu.memory_space<vmem>>, %arg6: memref<2x32x256xf32, #tpu.memory_space<vmem>>) attributes {dimension_semantics = [#tpu.dimension_semantics<parallel>], iteration_bounds = array<i64: 1>, scalar_prefetch = 0 : i64, scratch_operands = 0 : i64, tpu.core_type = #tpu.core_type<tc>, window_params = [{transform_indices = @transform_0, window_bounds = array<i64: 2, 32, 256>}, {pipeline_mode = #tpu.pipeline_mode<synchronous>, transform_indices = @transform_1, window_bounds = array<i64: 2, 32>}, {pipeline_mode = #tpu.pipeline_mode<synchronous>, transform_indices = @transform_2, window_bounds = array<i64: 1, 2>}, {pipeline_mode = #tpu.pipeline_mode<synchronous>, transform_indices = @transform_3, window_bounds = array<i64: 2, 32>}, {pipeline_mode = #tpu.pipeline_mode<synchronous>, transform_indices = @transform_4, window_bounds = array<i64: 1, 32>}, {transform_indices = @transform_5, window_bounds = array<i64: 2, 32, 256>}]} {
    %c0 = arith.constant 0 : index
    %c0_0 = arith.constant 0 : index
    %c0_1 = arith.constant 0 : index
    %0 = vector.load %arg1[%c0, %c0_0, %c0_1] : memref<2x32x256xf32, #tpu.memory_space<vmem>>, vector<2x32x256xf32>
    %cst = arith.constant dense<0.000000e+00> : vector<2x32xf32>
    %1 = vector.multi_reduction <add>, %0, %cst [2] : vector<2x32x256xf32> to vector<2x32xf32>
    %cst_2 = arith.constant 3.906250e-03 : f32
    %2 = vector.broadcast %cst_2 : f32 to vector<2x32xf32>
    %3 = arith.mulf %1, %2 : vector<2x32xf32>
    %c0_3 = arith.constant 0 : index
    %c0_4 = arith.constant 0 : index
    %4 = vector.load %arg3[%c0_3, %c0_4] : memref<1x2xf32, #tpu.memory_space<vmem>>, vector<1x2xf32>
    %c0_5 = arith.constant 0 : index
    %c0_6 = arith.constant 0 : index
    %5 = vector.load %arg5[%c0_5, %c0_6] : memref<1x32xf32, #tpu.memory_space<vmem>>, vector<1x32xf32>
    %c0_7 = arith.constant 0 : index
    %c0_8 = arith.constant 0 : index
    %6 = vector.load %arg2[%c0_7, %c0_8] : memref<2x32xf32, #tpu.memory_space<vmem>>, vector<2x32xf32>
    %c0_9 = arith.constant 0 : index
    %c0_10 = arith.constant 0 : index
    %7 = vector.load %arg4[%c0_9, %c0_10] : memref<2x32xf32, #tpu.memory_space<vmem>>, vector<2x32xf32>
    %8 = vector.shape_cast %3 : vector<2x32xf32> to vector<2x1x32xf32>
    %9 = vector.shape_cast %6 : vector<2x32xf32> to vector<1x2x32xf32>
    %10 = vector.broadcast %8 : vector<2x1x32xf32> to vector<2x2x32xf32>
    %11 = vector.broadcast %9 : vector<1x2x32xf32> to vector<2x2x32xf32>
    %12 = arith.mulf %10, %11 : vector<2x2x32xf32>
    %cst_11 = arith.constant dense<0.000000e+00> : vector<2x2xf32>
    %13 = vector.multi_reduction <add>, %12, %cst_11 [2] : vector<2x2x32xf32> to vector<2x2xf32>
    %14 = vector.broadcast %4 : vector<1x2xf32> to vector<2x2xf32>
    %15 = arith.addf %13, %14 : vector<2x2xf32>
    %cst_12 = arith.constant 0.000000e+00 : f32
    %16 = vector.broadcast %cst_12 : f32 to vector<2x2xf32>
    %17 = arith.maximumf %15, %16 : vector<2x2xf32>
    %18 = vector.shape_cast %17 : vector<2x2xf32> to vector<2x2x1xf32>
    %19 = vector.shape_cast %7 : vector<2x32xf32> to vector<1x2x32xf32>
    %20 = vector.broadcast %18 : vector<2x2x1xf32> to vector<2x2x32xf32>
    %21 = vector.broadcast %19 : vector<1x2x32xf32> to vector<2x2x32xf32>
    %22 = arith.mulf %20, %21 : vector<2x2x32xf32>
    %cst_13 = arith.constant dense<0.000000e+00> : vector<2x32xf32>
    %23 = vector.multi_reduction <add>, %22, %cst_13 [1] : vector<2x2x32xf32> to vector<2x32xf32>
    %24 = vector.broadcast %5 : vector<1x32xf32> to vector<2x32xf32>
    %25 = arith.addf %23, %24 : vector<2x32xf32>
    %26 = arith.negf %25 : vector<2x32xf32>
    %27 = math.exp %26 : vector<2x32xf32>
    %cst_14 = arith.constant 1.000000e+00 : f32
    %28 = vector.broadcast %cst_14 : f32 to vector<2x32xf32>
    %29 = arith.addf %28, %27 : vector<2x32xf32>
    %30 = arith.divf %28, %29 : vector<2x32xf32>
    %31 = vector.shape_cast %30 : vector<2x32xf32> to vector<2x32x1xf32>
    %32 = vector.broadcast %31 : vector<2x32x1xf32> to vector<2x32x256xf32>
    %33 = arith.mulf %0, %32 : vector<2x32x256xf32>
    %c0_15 = arith.constant 0 : index
    %c0_16 = arith.constant 0 : index
    %c0_17 = arith.constant 0 : index
    %34 = vector.load %arg6[%c0_15, %c0_16, %c0_17] : memref<2x32x256xf32, #tpu.memory_space<vmem>>, vector<2x32x256xf32>
    tpu.vector_store %arg6[%c0_15, %c0_16, %c0_17], %33 {strides = array<i32>} : memref<2x32x256xf32, #tpu.memory_space<vmem>>, vector<2x32x256xf32>,
    return
  }
  func.func @transform_0(%arg0: i32) -> (i32, i32, i32) {
    %c0_i32 = arith.constant 0 : i32
    %c0_i32_0 = arith.constant 0 : i32
    %c0_i32_1 = arith.constant 0 : i32
    return %arg0, %c0_i32, %c0_i32_0 : i32, i32, i32
  }
  func.func @transform_1(%arg0: i32) -> (i32, i32) {
    %c0_i32 = arith.constant 0 : i32
    %c0_i32_0 = arith.constant 0 : i32
    %c0_i32_1 = arith.constant 0 : i32
    return %c0_i32, %c0_i32_0 : i32, i32
  }
  func.func @transform_2(%arg0: i32) -> (i32, i32) {
    %c0_i32 = arith.constant 0 : i32
    %c0_i32_0 = arith.constant 0 : i32
    %c0_i32_1 = arith.constant 0 : i32
    return %c0_i32, %c0_i32_0 : i32, i32
  }
  func.func @transform_3(%arg0: i32) -> (i32, i32) {
    %c0_i32 = arith.constant 0 : i32
    %c0_i32_0 = arith.constant 0 : i32
    %c0_i32_1 = arith.constant 0 : i32
    return %c0_i32, %c0_i32_0 : i32, i32
  }
  func.func @transform_4(%arg0: i32) -> (i32, i32) {
    %c0_i32 = arith.constant 0 : i32
    %c0_i32_0 = arith.constant 0 : i32
    %c0_i32_1 = arith.constant 0 : i32
    return %c0_i32, %c0_i32_0 : i32, i32
  }
  func.func @transform_5(%arg0: i32) -> (i32, i32, i32) {
    %c0_i32 = arith.constant 0 : i32
    %c0_i32_0 = arith.constant 0 : i32
    %c0_i32_1 = arith.constant 0 : i32
    return %arg0, %c0_i32, %c0_i32_0 : i32, i32, i32
  }
}

</mosaic_0001>

<bundles_post_ra>
// kernel: tpu_custom_call.1
= control target key start
LH: loop header
LB: loop body
LE: loop exit
PB: predicated region body
PF: predicated region fallthrough
CT: control target
= control target key end

     0   :  { %10 = vsyncpa [#allocation3], 0  ;;  %s697_s0 = inlined_call_operand.hbm [shape: f32[2,32,256], index: 0, kind: input, shape index: {}]   ;;  %s698_s1 = inlined_call_operand.vmem [shape: f32[2,32], index: 1, kind: input, shape index: {}]   ;;  %s699_s2 = inlined_call_operand.vmem [shape: f32[1,2], index: 2, kind: input, shape index: {}]   ;;  %s700_s3 = inlined_call_operand.vmem [shape: f32[2,32], index: 3, kind: input, shape index: {}]   ;;  %s701_s4 = inlined_call_operand.vmem [shape: f32[1,32], index: 4, kind: input, shape index: {}]   ;;  %s702_s5 = inlined_call_operand.hbm [shape: f32[2,32,256], index: 5, kind: output, shape index: {}]  }
   0x1   :  { %11 = vsyncpa [#allocation4], 0  ;;  %s523_s18 = smov [#allocation2]   ;;  %s475_s22 = scalar_lea.hbm %s697_s0, 2048 }
   0x2   :  { %s17_s19 = sshll.u32 %s523_s18, 4  ;;  %p476_p0 = scmp.ne.s32.totalorder %s697_s0, %s475_s22  ;;  %s18_s19 = int_to_ptr.vmem [resolvable:$true] %s17_s19 }
   0x3   :  { %p479_p1 = scmp.lt.u32.totalorder %s475_s22, %s697_s0 }
   0x5   :  { %p481_p2 = pnand %p479_p1, %p476_p0 }
   0x7   :  { %484 = shalt.err (!%p481_p2)
}
   0x8   :  { %s485_s27 = scalar_lea.vmem %s18_s19, 2048  ;;  %p490_p4 = scmp.lt.s32.totalorder %s18_s19, %s18_s19 }
   0x9   :  { %p486_p3 = scmp.ne.s32.totalorder %s18_s19, %s485_s27  ;;  %p491_p5 = scmp.lt.s32.totalorder %s485_s27, %s485_s27 }
   0xb   :  { %p492_p6 = por %p491_p5, %p490_p4 }
   0xd   :  { %p493_p7 = pnand %p492_p6, %p486_p3 }
   0xf   :  { %496 = shalt.err (!%p493_p7)
}
  0x10   :  { %s524_s28 = smov 256   ;;  %s525_s29 = smov 16  }
  0x11   :  { %23 = dma.hbm_to_vmem [thread:$0]  %s697_s0, 2048, %s18_s19, [#allocation3], %s524_s28, %s524_s28, %s525_s29  }
  0x12   :  { %519 = dma.done.wait [#allocation3], 2048  }
  0x13   :  { %520 = vsyncadd [#allocation3], 4294965248  ;;  %v573_v0 = vld [vmem:[#allocation2 + $0x40] sm:$0xff]  ;;  %v575_v1 = vld [vmem:[#allocation2 + $0x48] sm:$0xff]  ;;  %v88_v24 = vlaneseq  ;;  %v526_v31 = vmov 0   ;;  %vm225_vm0 = vcmask 130112  }
  0x14   :  { %v577_v2 = vld [vmem:[#allocation2] sm:$0xff]  ;;  %v63_v3 = vadd.f32 %v575_v1, %v573_v0  ;;  %v581_v4 = vld [vmem:[#allocation2 + $0x8] sm:$0xff]  ;;  %v583_v5 = vld [vmem:[#allocation2 + $0x50] sm:$0xff]  ;;  %466 = vset.pattern.permute.xlu1 %v526_v31  ;;  %465 = vset.pattern.permute.xlu0 %v526_v31  ;;  %vm232_vm1 = vcmask 195712   ;;  %vm239_vm2 = vcmask 261312   ;;  %vm298_vm3 = vcmask 1041409  }
  0x15   :  { %v585_v6 = vld [vmem:[#allocation2 + $0x58] sm:$0xff]  ;;  %v51_v7 = vadd.f32 %v581_v4, %v577_v2  ;;  %v589_v8 = vld [vmem:[#allocation2 + $0x10] sm:$0xff]  ;;  %v597_v12 = vld [vmem:[#allocation2 + $0x60] sm:$0xff]  ;;  %v622_v25 = vshrl.u32 %v88_v24, 7  ;;  %vm303_vm4 = vcmask 254976  }
  0x16   :  { %v591_v9 = vld [vmem:[#allocation2 + $0x18] sm:$0xff]  ;;  %64 = vadd.xlane.f32.xlu1 %v63_v3  ;;  %v66_v10 = vadd.f32 %v585_v6, %v583_v5  ;;  %v599_v13 = vld [vmem:[#allocation2 + $0x68] sm:$0xff]  ;;  %v601_v14 = vld [vmem:[#allocation2 + $0x20] sm:$0xff] }
  0x17   :  { %52 = vadd.xlane.f32.xlu0 %v51_v7  ;;  %v54_v11 = vadd.f32 %v591_v9, %v589_v8  ;;  %v603_v15 = vld [vmem:[#allocation2 + $0x28] sm:$0xff]  ;;  %v69_v16 = vadd.f32 %v599_v13, %v597_v12  ;;  %v609_v18 = vld [vmem:[#allocation2 + $0x70] sm:$0xff]  ;;  %v611_v19 = vld [vmem:[#allocation2 + $0x78] sm:$0xff]  ;;  %v625_v26 = vsub.s32 0, %v622_v25  ;;  %v109_v29 = vsub.s32 1, %v622_v25 }
  0x18   :  { %v57_v17 = vadd.f32 %v603_v15, %v601_v14  ;;  %v613_v20 = vld [vmem:[#allocation2 + $0x30] sm:$0xff]  ;;  %v615_v21 = vld [vmem:[#allocation2 + $0x38] sm:$0xff]  ;;  %v72_v22 = vadd.f32 %v611_v19, %v609_v18  ;;  %v85_v27 = vld [vmem:[%s698_s1] sm:$0x3] }
  0x19   :  { %v60_v23 = vadd.f32 %v615_v21, %v613_v20  ;;  %v91_v28 = vrot.slane %v85_v27, %v625_v26  ;;  %v110_v30 = vrot.slane %v85_v27, %v109_v29 }
  0x1a   :  { %67 = vadd.xlane.f32.xlu1 %v66_v10 }
  0x1b   :  { %55 = vadd.xlane.f32.xlu0 %v54_v11 }
  0x1e   :  { %70 = vadd.xlane.f32.xlu1 %v69_v16 }
  0x1f   :  { %58 = vadd.xlane.f32.xlu0 %v57_v17 }
  0x22   :  { %73 = vadd.xlane.f32.xlu1 %v72_v22 }
  0x23   :  { %61 = vadd.xlane.f32.xlu0 %v60_v23 }
  0x33   :  { %97 = vbcast.lane.b32.xlu1 %v91_v28, 264 }
  0x37   :  { %112 = vbcast.lane.b32.xlu1 %v110_v30, 256 }
  0x39   :  { %93 = vbcast.lane.b32.xlu0 %v91_v28, 256 }
  0x3b   :  { %116 = vbcast.lane.b32.xlu1 %v110_v30, 264 }
  0x3d   :  { %101 = vbcast.lane.b32.xlu0 %v91_v28, 272 }
  0x3f   :  { %120 = vbcast.lane.b32.xlu1 %v110_v30, 272 }
  0x41   :  { %105 = vbcast.lane.b32.xlu0 %v91_v28, 280 }
  0x43   :  { %124 = vbcast.lane.b32.xlu1 %v110_v30, 280 }
  0xa3   :  { %v65_v32 = vpop.xlane.xlu1 %64 }
  0xa4   :  { %v53_v33 = vpop.xlane.xlu0 %52  ;;  %v79_v48 = vmul.f32 0.00390625, %v65_v32  ;;  %v215_v32 = vand.u32 127, %v88_v24 }
  0xa5   :  { %v75_v41 = vmul.f32 0.00390625, %v53_v33 }
  0xa7   :  { %v68_v34 = vpop.xlane.xlu1 %67 }
  0xa8   :  { %v56_v35 = vpop.xlane.xlu0 %55  ;;  %v80_v52 = vmul.f32 0.00390625, %v68_v34 }
  0xa9   :  { %v76_v40 = vmul.f32 0.00390625, %v56_v35  ;;  %v220_v35 = vadd.s32 4294967288, %v215_v32 }
  0xab   :  { %v71_v36 = vpop.xlane.xlu1 %70 }
  0xac   :  { %v59_v37 = vpop.xlane.xlu0 %58  ;;  %v81_v60 = vmul.f32 0.00390625, %v71_v36 }
  0xad   :  { %v77_v56 = vmul.f32 0.00390625, %v59_v37 }
  0xaf   :  { %v74_v38 = vpop.xlane.xlu1 %73 }
  0xb0   :  { %v62_v39 = vpop.xlane.xlu0 %61  ;;  %v82_v16 = vmul.f32 0.00390625, %v74_v38  ;;  %v227_v38 = vadd.s32 4294967280, %v215_v32 }
  0xb1   :  { %v78_v3 = vmul.f32 0.00390625, %v62_v39  ;;  %v234_v39 = vadd.s32 4294967272, %v215_v32 }
  0xb3   :  { %v98_v42 = vpop.permute.xlu1 %97 }
  0xb4   :  { %v135_v43 = vmul.f32 %v98_v42, %v76_v40  ;;  %v94_v44 = vpop.permute.xlu0 %93  ;;  %v143_v53 = vmul.f32 %v98_v42, %v80_v52 }
  0xb5   :  { %v134_v45 = vmul.f32 %v94_v44, %v75_v41  ;;  %v142_v50 = vmul.f32 %v94_v44, %v79_v48  ;;  %v230_v44 = vsub.s32 %v227_v38, %v622_v25 }
  0xb6   :  { %170 = vperm.xlu1 %466, %v135_v43  }
  0xb7   :  { %167 = vperm.xlu0 %465, %v134_v45   ;;  %v113_v46 = vpop.permute.xlu1 %112  ;;  %v237_v45 = vsub.s32 %v234_v39, %v622_v25 }
  0xb8   :  { %v138_v47 = vmul.f32 %v113_v46, %v75_v41  ;;  %v146_v54 = vmul.f32 %v113_v46, %v79_v48  ;;  %v102_v55 = vpop.permute.xlu0 %101  ;;  %v218_v41 = vsub.s32 %v215_v32, %v622_v25 }
  0xb9   :  { %v136_v57 = vmul.f32 %v102_v55, %v77_v56  ;;  %v144_v61 = vmul.f32 %v102_v55, %v81_v60 }
  0xba   :  { %179 = vperm.xlu1 %466, %v138_v47  }
  0xbb   :  { %v117_v49 = vpop.permute.xlu1 %116 }
  0xbc   :  { %v139_v51 = vmul.f32 %v117_v49, %v76_v40  ;;  %v147_v58 = vmul.f32 %v117_v49, %v80_v52  ;;  %v106_v63 = vpop.permute.xlu0 %105  ;;  %v223_v40 = vsub.s32 %v220_v35, %v622_v25 }
  0xbd   :  { %v137_v7 = vmul.f32 %v106_v63, %v78_v3  ;;  %v145_v17 = vmul.f32 %v106_v63, %v82_v16 }
  0xbe   :  { %191 = vperm.xlu1 %466, %v142_v50   ;;  %182 = vperm.xlu0 %465, %v139_v51  }
  0xbf   :  { %v121_v59 = vpop.permute.xlu1 %120 }
  0xc0   :  { %v140_v62 = vmul.f32 %v121_v59, %v77_v56  ;;  %v148_v10 = vmul.f32 %v121_v59, %v81_v60 }
  0xc2   :  { %203 = vperm.xlu1 %466, %v146_v54   ;;  %194 = vperm.xlu0 %465, %v143_v53  }
  0xc3   :  { %v125_v11 = vpop.permute.xlu1 %124 }
  0xc4   :  { %v141_v22 = vmul.f32 %v125_v11, %v78_v3  ;;  %v149_v23 = vmul.f32 %v125_v11, %v82_v16 }
  0xc6   :  { %206 = vperm.xlu0 %465, %v147_v58   ;;  %173 = vperm.xlu1 %466, %v136_v57  }
  0xca   :  { %185 = vperm.xlu0 %465, %v140_v62   ;;  %197 = vperm.xlu1 %466, %v144_v61  }
  0xce   :  { %209 = vperm.xlu0 %465, %v148_v10   ;;  %176 = vperm.xlu1 %466, %v137_v7  }
  0xd2   :  { %188 = vperm.xlu0 %465, %v141_v22   ;;  %200 = vperm.xlu1 %466, %v145_v17  }
  0xd6   :  { %212 = vperm.xlu0 %465, %v149_v23  }
 0x135   :  { %v171_v27 = vpop.permute.xlu1 %170 }
 0x136   :  { %v168_v28 = vpop.permute.xlu0 %167  ;;  %v224_v46 = vrot.slane %v171_v27, %v223_v40 }
 0x137   :  { %v219_v47 = vrot.slane %v168_v28, %v218_v41 }
 0x139   :  { %v180_v29 = vpop.permute.xlu1 %179  ;;  %v226_v54 = vsel %vm225_vm0, %v224_v46, %v219_v47 }
 0x13a   :  { %v244_v52 = vrot.slane %v180_v29, %v218_v41 }
 0x13d   :  { %v192_v30 = vpop.permute.xlu1 %191  ;;  %v183_v31 = vpop.permute.xlu0 %182 }
 0x13e   :  { %v248_v49 = vrot.slane %v183_v31, %v223_v40  ;;  %v263_v55 = vrot.slane %v192_v30, %v218_v41 }
 0x140   :  { %v249_v25 = vsel %vm225_vm0, %v248_v49, %v244_v52 }
 0x141   :  { %v204_v33 = vpop.permute.xlu1 %203  ;;  %v195_v34 = vpop.permute.xlu0 %194 }
 0x142   :  { %v267_v58 = vrot.slane %v195_v34, %v223_v40  ;;  %v282_v7 = vrot.slane %v204_v33, %v218_v41 }
 0x144   :  { %v268_v23 = vsel %vm225_vm0, %v267_v58, %v263_v55 }
 0x145   :  { %v174_v36 = vpop.permute.xlu1 %173  ;;  %v207_v37 = vpop.permute.xlu0 %206 }
 0x146   :  { %v231_v50 = vrot.slane %v174_v36, %v230_v44  ;;  %v286_v59 = vrot.slane %v207_v37, %v223_v40  ;;  %v456_v36 = vld [vmem:[%s699_s2] ss:$0 sm:$0xff] }
 0x148   :  { %v233_v61 = vsel %vm232_vm1, %v231_v50, %v226_v54  ;;  %v287_v27 = vsel %vm225_vm0, %v286_v59, %v282_v7 }
 0x149   :  { %v198_v42 = vpop.permute.xlu1 %197  ;;  %v186_v43 = vpop.permute.xlu0 %185 }
 0x14a   :  { %v253_v51 = vrot.slane %v186_v43, %v230_v44  ;;  %v272_v62 = vrot.slane %v198_v42, %v230_v44 }
 0x14c   :  { %v254_v63 = vsel %vm232_vm1, %v253_v51, %v249_v25  ;;  %v273_v30 = vsel %vm232_vm1, %v272_v62, %v268_v23  ;;  %v457_v25 = vld [vmem:[%s701_s4] ss:$0 sm:$0xff] }
 0x14d   :  { %v177_v24 = vpop.permute.xlu1 %176  ;;  %v210_v48 = vpop.permute.xlu0 %209 }
 0x14e   :  { %v238_v53 = vrot.slane %v177_v24, %v237_v45  ;;  %v291_v3 = vrot.slane %v210_v48, %v230_v44  ;;  %v86_v44 = vld [vmem:[%s700_s3] sm:$0x3]  ;;  %s527_s3 = smov [#allocation5]  }
 0x14f   :  { %s444_s4 = sshll.u32 %s527_s3, 4  ;;  %s445_s4 = int_to_ptr.vmem [resolvable:$true] %s444_s4 }
 0x150   :  { %v240_v11 = vsel %vm239_vm2, %v238_v53, %v233_v61  ;;  %v292_v31 = vsel %vm232_vm1, %v291_v3, %v287_v27  ;;  %s497_s12 = scalar_lea.vmem %s445_s4, 2048  ;;  %p502_p9 = scmp.lt.s32.totalorder %s445_s4, %s445_s4 }
 0x151   :  { %v201_v56 = vpop.permute.xlu1 %200  ;;  %v189_v57 = vpop.permute.xlu0 %188  ;;  %p498_p8 = scmp.ne.s32.totalorder %s445_s4, %s497_s12  ;;  %p503_p10 = scmp.lt.s32.totalorder %s497_s12, %s497_s12 }
 0x152   :  { %v258_v60 = vrot.slane %v189_v57, %v237_v45  ;;  %v277_v10 = vrot.slane %v201_v56, %v237_v45 }
 0x153   :  { %p504_p11 = por %p503_p10, %p502_p9 }
 0x154   :  { %v259_v16 = vsel %vm239_vm2, %v258_v60, %v254_v63  ;;  %v278_v32 = vsel %vm239_vm2, %v277_v10, %v273_v30 }
 0x155   :  { %v213_v17 = vpop.permute.xlu0 %212  ;;  %v299_v22 = vsel %vm298_vm3, %v259_v16, %v240_v11  ;;  %p505_p12 = pnand %p504_p11, %p498_p8 }
 0x156   :  { %v296_v28 = vrot.slane %v213_v17, %v237_v45  ;;  %v304_v29 = vsel %vm303_vm4, %v299_v22, 0.0 }
 0x157   :  { %305 = vadd.xlane.f32.xlu1 %v304_v29 }
 0x158   :  { %v297_v33 = vsel %vm239_vm2, %v296_v28, %v292_v31 }
 0x159   :  { %v300_v34 = vsel %vm298_vm3, %v297_v33, %v278_v32 }
 0x15a   :  { %v307_v35 = vsel %vm303_vm4, %v300_v34, 0.0 }
 0x15b   :  { %308 = vadd.xlane.f32.xlu0 %v307_v35 }
 0x171   :  { %316 = vbcast.lane.b32.xlu0 %v456_v36, 256 }
 0x1e4   :  { %v306_v38 = vpop.xlane.xlu1 %305 }
 0x1e8   :  { %v309_v37 = vpop.xlane.xlu0 %308 }
 0x1ec   :  { %v317_v39 = vpop.permute.xlu0 %316 }
 0x1ed   :  { %v319_v40 = vadd.f32 %v317_v39, %v306_v38  ;;  %v320_v41 = vadd.f32 %v317_v39, %v309_v37 }
 0x1ef   :  { %v321_v42 = vmax.f32 %v319_v40, 0.0  ;;  %v322_v43 = vmax.f32 %v320_v41, 0.0 }
 0x1f1   :  { %325 = vperm.xlu1 %466, %v321_v42  }
 0x1f5   :  { %330 = vperm.xlu1 %466, %v322_v43  }
 0x270   :  { %v326_v45 = vpop.permute.xlu1 %325 }
 0x271   :  { %v333_v46 = vmul.f32 %v326_v45, %v86_v44 }
 0x273   :  { %v335_v47 = vsel %vm303_vm4, %v333_v46, 0.0 }
 0x274   :  { %v336_v24 = vrot.slane %v335_v47, 4  ;;  %v331_v48 = vpop.permute.xlu1 %330 }
 0x275   :  { %v334_v49 = vmul.f32 %v331_v48, %v86_v44 }
 0x276   :  { %v337_v50 = vadd.f32 %v336_v24, %v335_v47 }
 0x277   :  { %v342_v51 = vsel %vm303_vm4, %v334_v49, 0.0 }
 0x278   :  { %v338_v52 = vrot.slane %v337_v50, 2  ;;  %v343_v53 = vrot.slane %v342_v51, 4 }
 0x27a   :  { %v339_v54 = vadd.f32 %v338_v52, %v337_v50  ;;  %v344_v55 = vadd.f32 %v343_v53, %v342_v51 }
 0x27c   :  { %v340_v56 = vrot.slane %v339_v54, 1  ;;  %v345_v57 = vrot.slane %v344_v55, 2 }
 0x27e   :  { %v341_v58 = vadd.f32 %v340_v56, %v339_v54  ;;  %v346_v59 = vadd.f32 %v345_v57, %v344_v55 }
 0x280   :  { %v355_v60 = vadd.f32 %v457_v25, %v341_v58  ;;  %v347_v61 = vrot.slane %v346_v59, 1 }
 0x282   :  { %v458_v62 = vmul.f32 -1.442695, %v355_v60  ;;  %v348_v63 = vadd.f32 %v347_v61, %v346_v59 }
 0x284   :  { %467 = vpow2.f32 %v458_v62  ;;  %v356_v3 = vadd.f32 %v457_v25, %v348_v63 }
 0x286   :  { %v459_v7 = vmul.f32 -1.442695, %v356_v3 }
 0x288   :  { %469 = vpow2.f32 %v459_v7 }
 0x28e   :  { %v468_v10 = vpop.eup %467 }
 0x28f   :  { %v363_v11 = vadd.f32 1.0, %v468_v10 }
 0x291   :  { %471 = vrcp.f32 %v363_v11 }
 0x292   :  { %v470_v16 = vpop.eup %469 }
 0x293   :  { %v364_v17 = vadd.f32 1.0, %v470_v16 }
 0x295   :  { %473 = vrcp.f32 %v364_v17 }
 0x29b   :  { %v472_v22 = vpop.eup %471 }
 0x29c   :  { %v372_v23 = vrot.slane %v472_v22, %v625_v26 }
 0x29e   :  { %378 = vbcast.lane.b32.xlu1 %v372_v23, 264  ;;  %374 = vbcast.lane.b32.xlu0 %v372_v23, 256 }
 0x29f   :  { %v474_v27 = vpop.eup %473 }
 0x2a0   :  { %v391_v28 = vrot.slane %v474_v27, %v625_v26 }
 0x2a2   :  { %386 = vbcast.lane.b32.xlu1 %v372_v23, 280  ;;  %382 = vbcast.lane.b32.xlu0 %v372_v23, 272 }
 0x2a6   :  { %397 = vbcast.lane.b32.xlu1 %v391_v28, 264  ;;  %393 = vbcast.lane.b32.xlu0 %v391_v28, 256 }
 0x2aa   :  { %405 = vbcast.lane.b32.xlu1 %v391_v28, 280  ;;  %401 = vbcast.lane.b32.xlu0 %v391_v28, 272 }
 0x310   :  { %v375_v29 = vpop.permute.xlu0 %374  ;;  %v379_v30 = vpop.permute.xlu1 %378 }
 0x311   :  { %v407_v31 = vmul.f32 %v375_v29, %v577_v2  ;;  %v408_v32 = vmul.f32 %v375_v29, %v581_v4  ;;  %v409_v33 = vmul.f32 %v379_v30, %v589_v8  ;;  %v410_v34 = vmul.f32 %v379_v30, %v591_v9 }
 0x313   :  { %423 = vst [vmem:[#allocation5] sm:$0xff] %v407_v31  ;;  %424 = vst [vmem:[#allocation5 + $0x8] sm:$0xff] %v408_v32 }
 0x314   :  { %425 = vst [vmem:[#allocation5 + $0x10] sm:$0xff] %v409_v33  ;;  %426 = vst [vmem:[#allocation5 + $0x18] sm:$0xff] %v410_v34  ;;  %v383_v35 = vpop.permute.xlu0 %382  ;;  %v387_v26 = vpop.permute.xlu1 %386 }
 0x315   :  { %v411_v36 = vmul.f32 %v383_v35, %v601_v14  ;;  %v412_v37 = vmul.f32 %v383_v35, %v603_v15  ;;  %v413_v38 = vmul.f32 %v387_v26, %v613_v20  ;;  %v414_v2 = vmul.f32 %v387_v26, %v615_v21 }
 0x317   :  { %427 = vst [vmem:[#allocation5 + $0x20] sm:$0xff] %v411_v36  ;;  %428 = vst [vmem:[#allocation5 + $0x28] sm:$0xff] %v412_v37 }
 0x318   :  { %429 = vst [vmem:[#allocation5 + $0x30] sm:$0xff] %v413_v38  ;;  %430 = vst [vmem:[#allocation5 + $0x38] sm:$0xff] %v414_v2  ;;  %v394_v4 = vpop.permute.xlu0 %393  ;;  %v398_v8 = vpop.permute.xlu1 %397 }
 0x319   :  { %v415_v9 = vmul.f32 %v394_v4, %v573_v0  ;;  %v416_v39 = vmul.f32 %v394_v4, %v575_v1  ;;  %v417_v40 = vmul.f32 %v398_v8, %v583_v5  ;;  %v418_v14 = vmul.f32 %v398_v8, %v585_v6 }
 0x31b   :  { %431 = vst [vmem:[#allocation5 + $0x40] sm:$0xff] %v415_v9  ;;  %432 = vst [vmem:[#allocation5 + $0x48] sm:$0xff] %v416_v39 }
 0x31c   :  { %433 = vst [vmem:[#allocation5 + $0x50] sm:$0xff] %v417_v40  ;;  %434 = vst [vmem:[#allocation5 + $0x58] sm:$0xff] %v418_v14  ;;  %v402_v15 = vpop.permute.xlu0 %401  ;;  %v406_v20 = vpop.permute.xlu1 %405 }
 0x31d   :  { %v419_v21 = vmul.f32 %v402_v15, %v597_v12  ;;  %v420_v41 = vmul.f32 %v402_v15, %v599_v13  ;;  %v421_v0 = vmul.f32 %v406_v20, %v609_v18  ;;  %v422_v1 = vmul.f32 %v406_v20, %v611_v19 }
 0x31f   :  { %435 = vst [vmem:[#allocation5 + $0x60] sm:$0xff] %v419_v21  ;;  %436 = vst [vmem:[#allocation5 + $0x68] sm:$0xff] %v420_v41 }
 0x320   :  { %437 = vst [vmem:[#allocation5 + $0x70] sm:$0xff] %v421_v0  ;;  %438 = vst [vmem:[#allocation5 + $0x78] sm:$0xff] %v422_v1 }
 0x321   :  { %508 = shalt.err (!%p505_p12)
}
 0x322   :  { %s509_s15 = scalar_lea.hbm %s702_s5, 2048 }
 0x323   :  { %p510_p13 = scmp.ne.s32.totalorder %s702_s5, %s509_s15  ;;  %p513_p0 = scmp.lt.u32.totalorder %s509_s15, %s702_s5 }
 0x325   :  { %p515_p1 = pnand %p513_p0, %p510_p13 }
 0x327   :  { %518 = shalt.err (!%p515_p1)
}
 0x328   :  { %450 = dma.vmem_to_hbm [thread:$0]  %s445_s4, 2048, %s702_s5, [#allocation4], %s524_s28, %s524_s28, %s525_s29  }
 0x329   :  { %521 = dma.done.wait [#allocation4], 2048  }
 0x32a   :  { %522 = vsyncadd [#allocation4], 4294965248 }
 0x32b   :  { %454 = vsyncpa [#allocation3], 1 }
 0x32c   :  { %455 = vsyncpa [#allocation4], 1 }

</bundles_post_ra>
